<compile_context>
chip_gen: v5e
topology: v5e:2x2
jax: 0.10.0
libtpu: 0.0.40
codegen_flags: <defaults>
</compile_context>

<pallas_src>
import functools

import jax
import jax.numpy as jnp
from jax.experimental import pallas as pl
from jax.experimental.pallas import tpu as pltpu


# --------------------------------------------------------------------------- #
# Kernel
# --------------------------------------------------------------------------- #
def _spatial_attention_kernel(x_ref, cm_ref, w_ref, b_ref, o_ref, mx_ref, sm_ref,
                              *, k, C, W, HW, TB):
    """One (batch-tile, channel-chunk) grid step.

    x_ref  : (TB, tc, HW) native dtype VMEM -- lane-dense channel chunk
    cm_ref : (k, HW) f32 VMEM   -- per-tap column-validity mask (precomputed)
    w_ref  : (2*k*k,) f32 SMEM  -- conv weight flattened from (1, 2, k, k) OIHW
    b_ref  : (1,)     f32 SMEM  -- conv bias
    o_ref  : (TB, 1, HW) VMEM   -- single attention map per sample
    mx_ref : (TB, 1, HW) f32 VMEM scratch -- running channel max
    sm_ref : (TB, 1, HW) f32 VMEM scratch -- running channel sum
    """
    c_idx = pl.program_id(1)

    x = x_ref[...]                                            # native dtype (no f32 copy)
    part_max = jnp.max(x, axis=1, keepdims=True)              # exact in bf16/f32
    part_sum = jnp.sum(x, axis=1, keepdims=True, dtype=jnp.float32)

    @pl.when(c_idx == 0)
    def _():
        mx_ref[...] = part_max.astype(jnp.float32)
        sm_ref[...] = part_sum

    @pl.when(c_idx > 0)
    def _():
        mx_ref[...] = jnp.maximum(mx_ref[...], part_max.astype(jnp.float32))
        sm_ref[...] = sm_ref[...] + part_sum

    @pl.when(c_idx == pl.num_programs(1) - 1)
    def _():
        p = k // 2
        halo = p * W + p                                      # max |flat tap offset|
        mx = mx_ref[...]                                      # (TB, 1, HW) channel max
        av = sm_ref[...] * jnp.float32(1.0 / C)               # channel mean
        if halo > 0:
            z = jnp.zeros((TB, 1, halo), jnp.float32)
            mx = jnp.concatenate([z, mx, z], axis=-1)         # (TB, 1, HW + 2*halo)
            av = jnp.concatenate([z, av, z], axis=-1)

        cmask = cm_ref[...]                                   # (k, HW)
        bias = b_ref[0]
        acc = jnp.full((TB, 1, HW), bias, dtype=jnp.float32)

        # 2-in / 1-out same-padded conv, fully unrolled over the 2*k*k taps.
        # Everything stays on the flat lane-dense (TB, 1, HW) layout:
        #   value(h+dh-p, w+dw-p) == flat[halo + i + (dh-p)*W + (dw-p)]
        # Row-OOB positions with valid columns land in the zero halo; column-OOB
        # positions (cross-row wrap) are zeroed by the precomputed column mask.
        for dh in range(k):
            for dw in range(k):
                s = halo + (dh - p) * W + (dw - p)
                w_mx = w_ref[dh * k + dw]                     # scalar (SMEM)
                w_av = w_ref[k * k + dh * k + dw]
                tap = (w_mx * jax.lax.slice_in_dim(mx, s, s + HW, axis=2)
                       + w_av * jax.lax.slice_in_dim(av, s, s + HW, axis=2))
                acc = acc + cmask[dw:dw + 1, :] * tap         # (1, HW) broadcast

        o_ref[...] = jax.nn.sigmoid(acc).astype(o_ref.dtype)


# --------------------------------------------------------------------------- #
# Tiling helpers
# --------------------------------------------------------------------------- #
def _vmem_capacity_bytes():
    """Generation-aware VMEM capacity (v5e/v6e 128 MiB, v7x 64 MiB per core)."""
    try:
        cap = getattr(pltpu.get_tpu_info(), "vmem_capacity_bytes", None)
        if cap:
            return int(cap)
    except Exception:
        pass
    return 64 * 1024 * 1024          # conservative fallback (v7x per-core)


def _divisors(n):
    return [d for d in range(1, n + 1) if n % d == 0]


def _pick_channel_tile(C, HW, itemsize, budget_bytes):
    """Channel chunk per grid step.  Must be block-shape legal (full C, or a
    multiple of the sublane pack) and its double-buffered block should fit the
    budget; never silently falls back to an oversized tc=C when smaller legal
    tiles exist."""
    per_ch = 2 * HW * itemsize                      # double-buffered bytes / channel
    if C * per_ch <= budget_bytes:
        return C
    pack = 8 * max(1, 4 // itemsize)                # 8 f32 / 16 bf16 / 32 int8
    legal = [d for d in range(pack, C, pack) if C % d == 0]
    if not legal:                                   # e.g. bf16 with only /8 divisors
        legal = [d for d in range(8, C, 8) if C % d == 0]
    fitting = [d for d in legal if d * per_ch <= budget_bytes]
    if fitting:
        return max(fitting)
    if legal:
        return min(legal)                           # minimize overshoot; limit has headroom
    return C                                        # no legal sub-tile exists (rare C)


def _pick_batch_tile(B, bytes_per_sample, budget_bytes,
                     target_bytes=2 * 1024 * 1024, min_parallel_bytes=512 * 1024):
    """Fuse a batch tile so per-step DMA blocks are >= ~2 MiB (amortize ~0.35us
    step overhead), but keep >=2 'parallel' grid entries (megacore / v7x dual
    TC) once blocks are already reasonably sized."""
    tb = 1
    for d in sorted(_divisors(B)):
        if 2 * d * bytes_per_sample > budget_bytes:                      # double-buffered
            break
        if B >= 2 and B // d < 2 and tb * bytes_per_sample >= min_parallel_bytes:
            break
        tb = d
        if tb * bytes_per_sample >= target_bytes:
            break
    return tb


# --------------------------------------------------------------------------- #
# Wrapper
# --------------------------------------------------------------------------- #
def spatial_attention(x, weight, bias, kernel_size):
    """x: (B, C, H, W); weight: (1, 2, k, k) f32 (OIHW); bias: (1,) f32."""
    B, C, H, W = x.shape
    k = int(kernel_size)
    assert k % 2 == 1, "Odd kernel size required"
    HW = H * W
    itemsize = jnp.dtype(x.dtype).itemsize

    vmem_cap = _vmem_capacity_bytes()
    in_budget = int(vmem_cap * 0.45)                 # double-buffered input window

    tc = _pick_channel_tile(C, HW, itemsize, in_budget)
    n_c = C // tc
    tb = _pick_batch_tile(B, tc * HW * itemsize, in_budget)
    n_b = B // tb

    x2 = x.reshape(B, C, HW)                         # lane-dense view (free)
    w_flat = weight.reshape(-1).astype(jnp.float32)  # (2*k*k,)
    b_flat = bias.reshape(-1).astype(jnp.float32)    # (1,)

    # Per-tap column-validity mask: 1.0 where (j % W) + (dw - p) stays in [0, W).
    col = jnp.tile(jnp.arange(W, dtype=jnp.int32), H)                 # (HW,)
    dwp = jnp.arange(k, dtype=jnp.int32) - (k // 2)                   # (k,)
    shifted = col[None, :] + dwp[:, None]
    col_mask = ((shifted >= 0) & (shifted < W)).astype(jnp.float32)   # (k, HW)

    in_block = tb * tc * HW * itemsize
    out_block = tb * HW * itemsize
    needed = (2 * in_block + 2 * out_block + 2 * k * HW * 4 + 2 * tb * HW * 4)
    vmem_limit = int(min(vmem_cap * 0.9,
                         max(32 * 1024 * 1024, needed + 8 * 1024 * 1024)))

    kernel = functools.partial(_spatial_attention_kernel,
                               k=k, C=C, W=W, HW=HW, TB=tb)

    att = pl.pallas_call(
        kernel,
        out_shape=jax.ShapeDtypeStruct((B, 1, HW), x.dtype),
        grid_spec=pltpu.PrefetchScalarGridSpec(
            num_scalar_prefetch=0,
            grid=(n_b, n_c),
            in_specs=[
                pl.BlockSpec((tb, tc, HW), lambda b, c: (b, c, 0)),
                pl.BlockSpec((k, HW), lambda b, c: (0, 0)),
                pl.BlockSpec(memory_space=pltpu.SMEM),
                pl.BlockSpec(memory_space=pltpu.SMEM),
            ],
            out_specs=pl.BlockSpec((tb, 1, HW), lambda b, c: (b, 0, 0)),
            scratch_shapes=[
                pltpu.VMEM((tb, 1, HW), jnp.float32),   # running channel max
                pltpu.VMEM((tb, 1, HW), jnp.float32),   # running channel sum
            ],
        ),
        compiler_params=pltpu.CompilerParams(
            dimension_semantics=("parallel", "arbitrary"),
            vmem_limit_bytes=vmem_limit,
        ),
    )(x2, col_mask, w_flat, b_flat)

    att = att.reshape(B, 1, H, W)
    # PyTorch's `.repeat(1, C, 1, 1)` done as a broadcast outside the kernel.
    # NOTE: at a jit boundary this materializes (B, C, H, W); callers fusing the
    # downstream `x * att` multiply should consume the (B, 1, H, W) map instead.
    return jnp.broadcast_to(att, (B, C, H, W))


# --------------------------------------------------------------------------- #
# Pure-JAX reference mirroring the PyTorch forward
# --------------------------------------------------------------------------- #
def _reference(x, weight, bias, k):
    xf = x.astype(jnp.float32)
    mx = jnp.max(xf, axis=1, keepdims=True)
    av = jnp.mean(xf, axis=1, keepdims=True)
    pool = jnp.concatenate([mx, av], axis=1)                      # (B, 2, H, W)
    conv = jax.lax.conv_general_dilated(
        pool, weight, window_strides=(1, 1),
        padding=[(k // 2, k // 2), (k // 2, k // 2)],
        dimension_numbers=("NCHW", "OIHW", "NCHW"),
    ) + bias.reshape(1, 1, 1, 1)
    conv = jnp.tile(conv, (1, x.shape[1], 1, 1))
    return jax.nn.sigmoid(conv)


if __name__ == "__main__":
    B, C, H, W = 2, 4, 16, 16
    kernel_size = 3

    key = jax.random.PRNGKey(0)
    kx, kw, kb = jax.random.split(key, 3)

    x = jax.random.normal(kx, (B, C, H, W), dtype=jnp.float32)

    # Deterministic Conv2d(2, 1, k) init (kaiming-uniform-like bounds).
    fan_in = 2 * kernel_size * kernel_size
    bound = 1.0 / jnp.sqrt(jnp.float32(fan_in))
    weight = jax.random.uniform(kw, (1, 2, kernel_size, kernel_size),
                                dtype=jnp.float32, minval=-bound, maxval=bound)
    bias = jax.random.uniform(kb, (1,), dtype=jnp.float32,
                              minval=-bound, maxval=bound)

    out = spatial_attention(x, weight, bias, kernel_size)
    out = jax.block_until_ready(out)

    ref = _reference(x, weight, bias, kernel_size)
    assert out.shape == (B, C, H, W)
    assert jnp.allclose(out, ref, atol=1e-5, rtol=1e-5), "mismatch vs reference"

    print("KERNEL_OK")
</pallas_src>

<mosaic_0001>
module attributes {stable_mosaic.version = 11 : i64} {
  func.func @_spatial_attention_kernel(%arg0: i32, %arg1: i32, %arg2: memref<2x4x256xf32, #tpu.memory_space<vmem>>, %arg3: memref<3x256xf32, #tpu.memory_space<vmem>>, %arg4: memref<18xf32, #tpu.memory_space<smem>>, %arg5: memref<1xf32, #tpu.memory_space<smem>>, %arg6: memref<2x1x256xf32, #tpu.memory_space<vmem>>, %arg7: memref<2x1x256xf32, #tpu.memory_space<vmem>>, %arg8: memref<2x1x256xf32, #tpu.memory_space<vmem>>) attributes {dimension_semantics = [#tpu.dimension_semantics<parallel>, #tpu.dimension_semantics<arbitrary>], iteration_bounds = array<i64: 1, 1>, scalar_prefetch = 0 : i64, scratch_operands = 2 : i64, tpu.core_type = #tpu.core_type<tc>, window_params = [{transform_indices = @transform_0, window_bounds = array<i64: 2, 4, 256>}, {pipeline_mode = #tpu.pipeline_mode<synchronous>, transform_indices = @transform_1, window_bounds = array<i64: 3, 256>}, {transform_indices = @transform_2, window_bounds = array<i64: 18>}, {transform_indices = @transform_3, window_bounds = array<i64: 1>}, {transform_indices = @transform_4, window_bounds = array<i64: 2, 1, 256>}]} {
    %c0 = arith.constant 0 : index
    %c0_0 = arith.constant 0 : index
    %c0_1 = arith.constant 0 : index
    %0 = vector.load %arg2[%c0, %c0_0, %c0_1] : memref<2x4x256xf32, #tpu.memory_space<vmem>>, vector<2x4x256xf32>
    %cst = arith.constant dense<0xFF800000> : vector<2x256xf32>
    %1 = vector.multi_reduction <maximumf>, %0, %cst [1] : vector<2x4x256xf32> to vector<2x256xf32>
    %2 = vector.shape_cast %1 : vector<2x256xf32> to vector<2x1x256xf32>
    %cst_2 = arith.constant dense<0.000000e+00> : vector<2x256xf32>
    %3 = vector.multi_reduction <add>, %0, %cst_2 [1] : vector<2x4x256xf32> to vector<2x256xf32>
    %4 = vector.shape_cast %3 : vector<2x256xf32> to vector<2x1x256xf32>
    %c0_i32 = arith.constant 0 : i32
    %5 = arith.cmpi eq, %arg1, %c0_i32 : i32
    %6 = arith.extui %5 : i1 to i32
    %c0_i32_3 = arith.constant 0 : i32
    %7 = arith.cmpi ne, %6, %c0_i32_3 : i32
    scf.if %7 {
      %c0_8 = arith.constant 0 : index
      %c0_9 = arith.constant 0 : index
      %c0_10 = arith.constant 0 : index
      %14 = vector.load %arg7[%c0_8, %c0_9, %c0_10] : memref<2x1x256xf32, #tpu.memory_space<vmem>>, vector<2x1x256xf32>
      tpu.vector_store %arg7[%c0_8, %c0_9, %c0_10], %2 {strides = array<i32>} : memref<2x1x256xf32, #tpu.memory_space<vmem>>, vector<2x1x256xf32>,
      %c0_11 = arith.constant 0 : index
      %c0_12 = arith.constant 0 : index
      %c0_13 = arith.constant 0 : index
      %15 = vector.load %arg8[%c0_11, %c0_12, %c0_13] : memref<2x1x256xf32, #tpu.memory_space<vmem>>, vector<2x1x256xf32>
      tpu.vector_store %arg8[%c0_11, %c0_12, %c0_13], %4 {strides = array<i32>} : memref<2x1x256xf32, #tpu.memory_space<vmem>>, vector<2x1x256xf32>,
    } else {
    }
    %c0_i32_4 = arith.constant 0 : i32
    %8 = arith.cmpi sgt, %arg1, %c0_i32_4 : i32
    %9 = arith.extui %8 : i1 to i32
    %c0_i32_5 = arith.constant 0 : i32
    %10 = arith.cmpi ne, %9, %c0_i32_5 : i32
    scf.if %10 {
      %c0_8 = arith.constant 0 : index
      %c0_9 = arith.constant 0 : index
      %c0_10 = arith.constant 0 : index
      %14 = vector.load %arg7[%c0_8, %c0_9, %c0_10] : memref<2x1x256xf32, #tpu.memory_space<vmem>>, vector<2x1x256xf32>
      %15 = arith.maximumf %14, %2 : vector<2x1x256xf32>
      %c0_11 = arith.constant 0 : index
      %c0_12 = arith.constant 0 : index
      %c0_13 = arith.constant 0 : index
      %16 = vector.load %arg7[%c0_11, %c0_12, %c0_13] : memref<2x1x256xf32, #tpu.memory_space<vmem>>, vector<2x1x256xf32>
      tpu.vector_store %arg7[%c0_11, %c0_12, %c0_13], %15 {strides = array<i32>} : memref<2x1x256xf32, #tpu.memory_space<vmem>>, vector<2x1x256xf32>,
      %c0_14 = arith.constant 0 : index
      %c0_15 = arith.constant 0 : index
      %c0_16 = arith.constant 0 : index
      %17 = vector.load %arg8[%c0_14, %c0_15, %c0_16] : memref<2x1x256xf32, #tpu.memory_space<vmem>>, vector<2x1x256xf32>
      %18 = arith.addf %17, %4 : vector<2x1x256xf32>
      %c0_17 = arith.constant 0 : index
      %c0_18 = arith.constant 0 : index
      %c0_19 = arith.constant 0 : index
      %19 = vector.load %arg8[%c0_17, %c0_18, %c0_19] : memref<2x1x256xf32, #tpu.memory_space<vmem>>, vector<2x1x256xf32>
      tpu.vector_store %arg8[%c0_17, %c0_18, %c0_19], %18 {strides = array<i32>} : memref<2x1x256xf32, #tpu.memory_space<vmem>>, vector<2x1x256xf32>,
    } else {
    }
    %c0_i32_6 = arith.constant 0 : i32
    %11 = arith.cmpi eq, %arg1, %c0_i32_6 : i32
    %12 = arith.extui %11 : i1 to i32
    %c0_i32_7 = arith.constant 0 : i32
    %13 = arith.cmpi ne, %12, %c0_i32_7 : i32
    scf.if %13 {
      %c0_8 = arith.constant 0 : index
      %c0_9 = arith.constant 0 : index
      %c0_10 = arith.constant 0 : index
      %14 = vector.load %arg7[%c0_8, %c0_9, %c0_10] : memref<2x1x256xf32, #tpu.memory_space<vmem>>, vector<2x1x256xf32>
      %c0_11 = arith.constant 0 : index
      %c0_12 = arith.constant 0 : index
      %c0_13 = arith.constant 0 : index
      %15 = vector.load %arg8[%c0_11, %c0_12, %c0_13] : memref<2x1x256xf32, #tpu.memory_space<vmem>>, vector<2x1x256xf32>
      %cst_14 = arith.constant 2.500000e-01 : f32
      %16 = vector.broadcast %cst_14 : f32 to vector<2x1x256xf32>
      %17 = arith.mulf %15, %16 : vector<2x1x256xf32>
      %cst_15 = arith.constant 0.000000e+00 : f32
      %18 = vector.broadcast %cst_15 : f32 to vector<2x1x17xf32>
      %19 = tpu.concatenate %18, %14, %18 in 2 : vector<2x1x17xf32>, vector<2x1x256xf32>, vector<2x1x17xf32> -> vector<2x1x290xf32>
      %20 = tpu.concatenate %18, %17, %18 in 2 : vector<2x1x17xf32>, vector<2x1x256xf32>, vector<2x1x17xf32> -> vector<2x1x290xf32>
      %c0_16 = arith.constant 0 : index
      %c0_17 = arith.constant 0 : index
      %21 = vector.load %arg3[%c0_16, %c0_17] : memref<3x256xf32, #tpu.memory_space<vmem>>, vector<3x256xf32>
      %c0_18 = arith.constant 0 : index
      %22 = memref.load %arg5[%c0_18] : memref<1xf32, #tpu.memory_space<smem>>
      %23 = vector.broadcast %22 : f32 to vector<2x1x256xf32>
      %c0_19 = arith.constant 0 : index
      %24 = memref.load %arg4[%c0_19] : memref<18xf32, #tpu.memory_space<smem>>
      %c9 = arith.constant 9 : index
      %25 = memref.load %arg4[%c9] : memref<18xf32, #tpu.memory_space<smem>>
      %26 = vector.extract_strided_slice %19 {offsets = [0, 0, 0], sizes = [2, 1, 256], strides = [1, 1, 1]} : vector<2x1x290xf32> to vector<2x1x256xf32>
      %27 = vector.broadcast %24 : f32 to vector<2x1x256xf32>
      %28 = arith.mulf %27, %26 : vector<2x1x256xf32>
      %29 = vector.extract_strided_slice %20 {offsets = [0, 0, 0], sizes = [2, 1, 256], strides = [1, 1, 1]} : vector<2x1x290xf32> to vector<2x1x256xf32>
      %30 = vector.broadcast %25 : f32 to vector<2x1x256xf32>
      %31 = arith.mulf %30, %29 : vector<2x1x256xf32>
      %32 = arith.addf %28, %31 : vector<2x1x256xf32>
      %33 = vector.extract_strided_slice %21 {offsets = [0, 0], sizes = [1, 256], strides = [1, 1]} : vector<3x256xf32> to vector<1x256xf32>
      %34 = vector.shape_cast %33 : vector<1x256xf32> to vector<1x1x256xf32>
      %35 = vector.broadcast %34 : vector<1x1x256xf32> to vector<2x1x256xf32>
      %36 = arith.mulf %35, %32 : vector<2x1x256xf32>
      %37 = arith.addf %23, %36 : vector<2x1x256xf32>
      %c1 = arith.constant 1 : index
      %38 = memref.load %arg4[%c1] : memref<18xf32, #tpu.memory_space<smem>>
      %c10 = arith.constant 10 : index
      %39 = memref.load %arg4[%c10] : memref<18xf32, #tpu.memory_space<smem>>
      %40 = vector.extract_strided_slice %19 {offsets = [0, 0, 1], sizes = [2, 1, 256], strides = [1, 1, 1]} : vector<2x1x290xf32> to vector<2x1x256xf32>
      %41 = vector.broadcast %38 : f32 to vector<2x1x256xf32>
      %42 = arith.mulf %41, %40 : vector<2x1x256xf32>
      %43 = vector.extract_strided_slice %20 {offsets = [0, 0, 1], sizes = [2, 1, 256], strides = [1, 1, 1]} : vector<2x1x290xf32> to vector<2x1x256xf32>
      %44 = vector.broadcast %39 : f32 to vector<2x1x256xf32>
      %45 = arith.mulf %44, %43 : vector<2x1x256xf32>
      %46 = arith.addf %42, %45 : vector<2x1x256xf32>
      %47 = vector.extract_strided_slice %21 {offsets = [1, 0], sizes = [1, 256], strides = [1, 1]} : vector<3x256xf32> to vector<1x256xf32>
      %48 = vector.shape_cast %47 : vector<1x256xf32> to vector<1x1x256xf32>
      %49 = vector.broadcast %48 : vector<1x1x256xf32> to vector<2x1x256xf32>
      %50 = arith.mulf %49, %46 : vector<2x1x256xf32>
      %51 = arith.addf %37, %50 : vector<2x1x256xf32>
      %c2 = arith.constant 2 : index
      %52 = memref.load %arg4[%c2] : memref<18xf32, #tpu.memory_space<smem>>
      %c11 = arith.constant 11 : index
      %53 = memref.load %arg4[%c11] : memref<18xf32, #tpu.memory_space<smem>>
      %54 = vector.extract_strided_slice %19 {offsets = [0, 0, 2], sizes = [2, 1, 256], strides = [1, 1, 1]} : vector<2x1x290xf32> to vector<2x1x256xf32>
      %55 = vector.broadcast %52 : f32 to vector<2x1x256xf32>
      %56 = arith.mulf %55, %54 : vector<2x1x256xf32>
      %57 = vector.extract_strided_slice %20 {offsets = [0, 0, 2], sizes = [2, 1, 256], strides = [1, 1, 1]} : vector<2x1x290xf32> to vector<2x1x256xf32>
      %58 = vector.broadcast %53 : f32 to vector<2x1x256xf32>
      %59 = arith.mulf %58, %57 : vector<2x1x256xf32>
      %60 = arith.addf %56, %59 : vector<2x1x256xf32>
      %61 = vector.extract_strided_slice %21 {offsets = [2, 0], sizes = [1, 256], strides = [1, 1]} : vector<3x256xf32> to vector<1x256xf32>
      %62 = vector.shape_cast %61 : vector<1x256xf32> to vector<1x1x256xf32>
      %63 = vector.broadcast %62 : vector<1x1x256xf32> to vector<2x1x256xf32>
      %64 = arith.mulf %63, %60 : vector<2x1x256xf32>
      %65 = arith.addf %51, %64 : vector<2x1x256xf32>
      %c3 = arith.constant 3 : index
      %66 = memref.load %arg4[%c3] : memref<18xf32, #tpu.memory_space<smem>>
      %c12 = arith.constant 12 : index
      %67 = memref.load %arg4[%c12] : memref<18xf32, #tpu.memory_space<smem>>
      %68 = vector.extract_strided_slice %19 {offsets = [0, 0, 16], sizes = [2, 1, 256], strides = [1, 1, 1]} : vector<2x1x290xf32> to vector<2x1x256xf32>
      %69 = vector.broadcast %66 : f32 to vector<2x1x256xf32>
      %70 = arith.mulf %69, %68 : vector<2x1x256xf32>
      %71 = vector.extract_strided_slice %20 {offsets = [0, 0, 16], sizes = [2, 1, 256], strides = [1, 1, 1]} : vector<2x1x290xf32> to vector<2x1x256xf32>
      %72 = vector.broadcast %67 : f32 to vector<2x1x256xf32>
      %73 = arith.mulf %72, %71 : vector<2x1x256xf32>
      %74 = arith.addf %70, %73 : vector<2x1x256xf32>
      %75 = vector.extract_strided_slice %21 {offsets = [0, 0], sizes = [1, 256], strides = [1, 1]} : vector<3x256xf32> to vector<1x256xf32>
      %76 = vector.shape_cast %75 : vector<1x256xf32> to vector<1x1x256xf32>
      %77 = vector.broadcast %76 : vector<1x1x256xf32> to vector<2x1x256xf32>
      %78 = arith.mulf %77, %74 : vector<2x1x256xf32>
      %79 = arith.addf %65, %78 : vector<2x1x256xf32>
      %c4 = arith.constant 4 : index
      %80 = memref.load %arg4[%c4] : memref<18xf32, #tpu.memory_space<smem>>
      %c13 = arith.constant 13 : index
      %81 = memref.load %arg4[%c13] : memref<18xf32, #tpu.memory_space<smem>>
      %82 = vector.extract_strided_slice %19 {offsets = [0, 0, 17], sizes = [2, 1, 256], strides = [1, 1, 1]} : vector<2x1x290xf32> to vector<2x1x256xf32>
      %83 = vector.broadcast %80 : f32 to vector<2x1x256xf32>
      %84 = arith.mulf %83, %82 : vector<2x1x256xf32>
      %85 = vector.extract_strided_slice %20 {offsets = [0, 0, 17], sizes = [2, 1, 256], strides = [1, 1, 1]} : vector<2x1x290xf32> to vector<2x1x256xf32>
      %86 = vector.broadcast %81 : f32 to vector<2x1x256xf32>
      %87 = arith.mulf %86, %85 : vector<2x1x256xf32>
      %88 = arith.addf %84, %87 : vector<2x1x256xf32>
      %89 = vector.extract_strided_slice %21 {offsets = [1, 0], sizes = [1, 256], strides = [1, 1]} : vector<3x256xf32> to vector<1x256xf32>
      %90 = vector.shape_cast %89 : vector<1x256xf32> to vector<1x1x256xf32>
      %91 = vector.broadcast %90 : vector<1x1x256xf32> to vector<2x1x256xf32>
      %92 = arith.mulf %91, %88 : vector<2x1x256xf32>
      %93 = arith.addf %79, %92 : vector<2x1x256xf32>
      %c5 = arith.constant 5 : index
      %94 = memref.load %arg4[%c5] : memref<18xf32, #tpu.memory_space<smem>>
      %c14 = arith.constant 14 : index
      %95 = memref.load %arg4[%c14] : memref<18xf32, #tpu.memory_space<smem>>
      %96 = vector.extract_strided_slice %19 {offsets = [0, 0, 18], sizes = [2, 1, 256], strides = [1, 1, 1]} : vector<2x1x290xf32> to vector<2x1x256xf32>
      %97 = vector.broadcast %94 : f32 to vector<2x1x256xf32>
      %98 = arith.mulf %97, %96 : vector<2x1x256xf32>
      %99 = vector.extract_strided_slice %20 {offsets = [0, 0, 18], sizes = [2, 1, 256], strides = [1, 1, 1]} : vector<2x1x290xf32> to vector<2x1x256xf32>
      %100 = vector.broadcast %95 : f32 to vector<2x1x256xf32>
      %101 = arith.mulf %100, %99 : vector<2x1x256xf32>
      %102 = arith.addf %98, %101 : vector<2x1x256xf32>
      %103 = vector.extract_strided_slice %21 {offsets = [2, 0], sizes = [1, 256], strides = [1, 1]} : vector<3x256xf32> to vector<1x256xf32>
      %104 = vector.shape_cast %103 : vector<1x256xf32> to vector<1x1x256xf32>
      %105 = vector.broadcast %104 : vector<1x1x256xf32> to vector<2x1x256xf32>
      %106 = arith.mulf %105, %102 : vector<2x1x256xf32>
      %107 = arith.addf %93, %106 : vector<2x1x256xf32>
      %c6 = arith.constant 6 : index
      %108 = memref.load %arg4[%c6] : memref<18xf32, #tpu.memory_space<smem>>
      %c15 = arith.constant 15 : index
      %109 = memref.load %arg4[%c15] : memref<18xf32, #tpu.memory_space<smem>>
      %110 = vector.extract_strided_slice %19 {offsets = [0, 0, 32], sizes = [2, 1, 256], strides = [1, 1, 1]} : vector<2x1x290xf32> to vector<2x1x256xf32>
      %111 = vector.broadcast %108 : f32 to vector<2x1x256xf32>
      %112 = arith.mulf %111, %110 : vector<2x1x256xf32>
      %113 = vector.extract_strided_slice %20 {offsets = [0, 0, 32], sizes = [2, 1, 256], strides = [1, 1, 1]} : vector<2x1x290xf32> to vector<2x1x256xf32>
      %114 = vector.broadcast %109 : f32 to vector<2x1x256xf32>
      %115 = arith.mulf %114, %113 : vector<2x1x256xf32>
      %116 = arith.addf %112, %115 : vector<2x1x256xf32>
      %117 = vector.extract_strided_slice %21 {offsets = [0, 0], sizes = [1, 256], strides = [1, 1]} : vector<3x256xf32> to vector<1x256xf32>
      %118 = vector.shape_cast %117 : vector<1x256xf32> to vector<1x1x256xf32>
      %119 = vector.broadcast %118 : vector<1x1x256xf32> to vector<2x1x256xf32>
      %120 = arith.mulf %119, %116 : vector<2x1x256xf32>
      %121 = arith.addf %107, %120 : vector<2x1x256xf32>
      %c7 = arith.constant 7 : index
      %122 = memref.load %arg4[%c7] : memref<18xf32, #tpu.memory_space<smem>>
      %c16 = arith.constant 16 : index
      %123 = memref.load %arg4[%c16] : memref<18xf32, #tpu.memory_space<smem>>
      %124 = vector.extract_strided_slice %19 {offsets = [0, 0, 33], sizes = [2, 1, 256], strides = [1, 1, 1]} : vector<2x1x290xf32> to vector<2x1x256xf32>
      %125 = vector.broadcast %122 : f32 to vector<2x1x256xf32>
      %126 = arith.mulf %125, %124 : vector<2x1x256xf32>
      %127 = vector.extract_strided_slice %20 {offsets = [0, 0, 33], sizes = [2, 1, 256], strides = [1, 1, 1]} : vector<2x1x290xf32> to vector<2x1x256xf32>
      %128 = vector.broadcast %123 : f32 to vector<2x1x256xf32>
      %129 = arith.mulf %128, %127 : vector<2x1x256xf32>
      %130 = arith.addf %126, %129 : vector<2x1x256xf32>
      %131 = vector.extract_strided_slice %21 {offsets = [1, 0], sizes = [1, 256], strides = [1, 1]} : vector<3x256xf32> to vector<1x256xf32>
      %132 = vector.shape_cast %131 : vector<1x256xf32> to vector<1x1x256xf32>
      %133 = vector.broadcast %132 : vector<1x1x256xf32> to vector<2x1x256xf32>
      %134 = arith.mulf %133, %130 : vector<2x1x256xf32>
      %135 = arith.addf %121, %134 : vector<2x1x256xf32>
      %c8 = arith.constant 8 : index
      %136 = memref.load %arg4[%c8] : memref<18xf32, #tpu.memory_space<smem>>
      %c17 = arith.constant 17 : index
      %137 = memref.load %arg4[%c17] : memref<18xf32, #tpu.memory_space<smem>>
      %138 = vector.extract_strided_slice %19 {offsets = [0, 0, 34], sizes = [2, 1, 256], strides = [1, 1, 1]} : vector<2x1x290xf32> to vector<2x1x256xf32>
      %139 = vector.broadcast %136 : f32 to vector<2x1x256xf32>
      %140 = arith.mulf %139, %138 : vector<2x1x256xf32>
      %141 = vector.extract_strided_slice %20 {offsets = [0, 0, 34], sizes = [2, 1, 256], strides = [1, 1, 1]} : vector<2x1x290xf32> to vector<2x1x256xf32>
      %142 = vector.broadcast %137 : f32 to vector<2x1x256xf32>
      %143 = arith.mulf %142, %141 : vector<2x1x256xf32>
      %144 = arith.addf %140, %143 : vector<2x1x256xf32>
      %145 = vector.extract_strided_slice %21 {offsets = [2, 0], sizes = [1, 256], strides = [1, 1]} : vector<3x256xf32> to vector<1x256xf32>
      %146 = vector.shape_cast %145 : vector<1x256xf32> to vector<1x1x256xf32>
      %147 = vector.broadcast %146 : vector<1x1x256xf32> to vector<2x1x256xf32>
      %148 = arith.mulf %147, %144 : vector<2x1x256xf32>
      %149 = arith.addf %135, %148 : vector<2x1x256xf32>
      %150 = arith.negf %149 : vector<2x1x256xf32>
      %151 = math.exp %150 : vector<2x1x256xf32>
      %cst_20 = arith.constant 1.000000e+00 : f32
      %152 = vector.broadcast %cst_20 : f32 to vector<2x1x256xf32>
      %153 = arith.addf %152, %151 : vector<2x1x256xf32>
      %154 = arith.divf %152, %153 : vector<2x1x256xf32>
      %c0_21 = arith.constant 0 : index
      %c0_22 = arith.constant 0 : index
      %c0_23 = arith.constant 0 : index
      %155 = vector.load %arg6[%c0_21, %c0_22, %c0_23] : memref<2x1x256xf32, #tpu.memory_space<vmem>>, vector<2x1x256xf32>
      tpu.vector_store %arg6[%c0_21, %c0_22, %c0_23], %154 {strides = array<i32>} : memref<2x1x256xf32, #tpu.memory_space<vmem>>, vector<2x1x256xf32>,
    } else {
    }
    return
  }
  func.func @transform_0(%arg0: i32, %arg1: i32) -> (i32, i32, i32) {
    %c0_i32 = arith.constant 0 : i32
    %c0_i32_0 = arith.constant 0 : i32
    return %arg0, %arg1, %c0_i32 : i32, i32, i32
  }
  func.func @transform_1(%arg0: i32, %arg1: i32) -> (i32, i32) {
    %c0_i32 = arith.constant 0 : i32
    %c0_i32_0 = arith.constant 0 : i32
    %c0_i32_1 = arith.constant 0 : i32
    return %c0_i32, %c0_i32_0 : i32, i32
  }
  func.func @transform_2(%arg0: i32, %arg1: i32) -> i32 {
    %c0_i32 = arith.constant 0 : i32
    %c0_i32_0 = arith.constant 0 : i32
    return %c0_i32 : i32
  }
  func.func @transform_3(%arg0: i32, %arg1: i32) -> i32 {
    %c0_i32 = arith.constant 0 : i32
    %c0_i32_0 = arith.constant 0 : i32
    return %c0_i32 : i32
  }
  func.func @transform_4(%arg0: i32, %arg1: i32) -> (i32, i32, i32) {
    %c0_i32 = arith.constant 0 : i32
    %c0_i32_0 = arith.constant 0 : i32
    %c0_i32_1 = arith.constant 0 : i32
    return %arg0, %c0_i32, %c0_i32_0 : i32, i32, i32
  }
}

</mosaic_0001>

<bundles_post_ra>
// kernel: tpu_custom_call.1
= control target key start
LH: loop header
LB: loop body
LE: loop exit
PB: predicated region body
PF: predicated region fallthrough
CT: control target
= control target key end

     0   :  { %10 = vsyncpa [#allocation6], 0  ;;  %s1613_s0 = inlined_call_operand.hbm [shape: f32[2,4,256], index: 0, kind: input, shape index: {}]   ;;  %s1614_s1 = inlined_call_operand.hbm [shape: f32[3,256], index: 1, kind: input, shape index: {}]   ;;  %s1615_s2 = inlined_call_operand.vmem [shape: f32[18], index: 2, kind: input, shape index: {}]   ;;  %s1616_s3 = inlined_call_operand.<no memory space> [shape: f32[1], index: 3, kind: input, shape index: {}]   ;;  %s1617_s4 = inlined_call_operand.hbm [shape: f32[2,1,256], index: 4, kind: output, shape index: {}]  }
   0x1   :  { %11 = vsyncpa [#allocation10], 0 }
   0x2   :  { %12 = vsyncpa [#allocation8], 0 }
   0x3   :  { %13 = vsyncpa [#allocation7], 0  ;;  %s18_s17 = sshll.u32 %s1613_s0, 4  ;;  %s1048_s18 = smov [#allocation5]   ;;  %s19_s17 = int_to_ptr.hbm [resolvable:$true] %s18_s17 }
   0x4   :  { %s20_s19 = sshll.u32 %s1048_s18, 4  ;;  %s32_s22 = sshll.u32 %s1614_s1, 4  ;;  %s21_s19 = int_to_ptr.vmem [resolvable:$true] %s20_s19  ;;  %s33_s22 = int_to_ptr.hbm [resolvable:$true] %s32_s22 }
   0x5   :  { %s1049_s23 = smov 128   ;;  %s1050_s24 = smov 8  }
   0x6   :  { %26 = dma.hbm_to_vmem [thread:$0]  %s19_s17, 256, %s21_s19, [#allocation6], %s1049_s23, %s1049_s23, %s1050_s24  }
   0x7   :  { %s1051_s25 = smov [#allocation9]   ;;  %s43_s29 = sshll.u32 %s1615_s2, 4  ;;  %s44_s29 = int_to_ptr.vmem [resolvable:$true] %s43_s29 }
   0x8   :  { %s34_s26 = sshll.u32 %s1051_s25, 4  ;;  %s1052_s0 = smov [#allocation11]   ;;  %s35_s26 = int_to_ptr.vmem [resolvable:$true] %s34_s26 }
   0x9   :  { %37 = dma.hbm_to_vmem [thread:$0]  %s33_s22, 128, %s35_s26, [#allocation10]  }
   0xa   :  { %46 = dma.vmem_to_smem %s44_s29, 16, %s1052_s0, [#allocation8]  }
   0xb   :  { %1040 = dma.done.wait [#allocation6], 256  }
   0xc   :  { %1041 = vsyncadd [#allocation6], 4294967040 }
   0xd   :  { %1042 = dma.done.wait [#allocation10], 128  }
   0xe   :  { %1043 = vsyncadd [#allocation10], 4294967168 }
   0xf   :  { %1044 = dma.done.wait [#allocation8], 16  }
  0x10   :  { %1045 = vsyncadd [#allocation8], 4294967280 }
  0x11   :  { %61 = sfence }
  0x12   :  { %v63_v0 = vld [vmem:[#allocation5 + $0x8] sm:$0xff]  ;;  %v62_v1 = vld [vmem:[#allocation5] sm:$0xff]  ;;  %vm77_vm0 = vcmask 1043456   ;;  %v160_v24 = vlaneseq  ;;  %vm155_vm1 = vcmask 1040384   ;;  %s1053_s1 = smov 17   ;;  %s910_s2 = sld [smem:[#allocation11 + $0xc]] }
  0x13   :  { %70 = vst [vmem:[#allocation1 + $0x10] ss:$2 sm:$0xff] %v63_v0  ;;  %s902_s30 = sld [smem:[#allocation11 + $0xa]]  ;;  %vm242_vm3 = vcmask 138240   ;;  %s1054_s13 = smov 112   ;;  %vm363_vm4 = vcmask 1039360  }
  0x14   :  { %66 = vst [vmem:[#allocation1] ss:$2 sm:$0xff] %v62_v1  ;;  %vm1107_vm2 = vcmp.lt.s32.totalorder %v160_v24, 256  ;;  %s909_s5 = sld [smem:[#allocation11 + $0x3]]  ;;  %s1055_s14 = smov 127   ;;  %vm430_vm5 = vcmask 1031168  }
  0x15   :  { %s901_s6 = sld [smem:[#allocation11 + $0x1]]  ;;  %s1056_s17 = smov 96   ;;  %vm552_vm6 = vcmask 908288   ;;  %vm493_vm7 = vcmask 916480   ;;  %vm619_vm8 = vcmask 900096   ;;  %vm682_vm9 = vcmask 785408  }
  0x16   :  { %s919_s7 = sld [smem:[#allocation11 + $0x6]]  ;;  %s1057_s20 = smov 126   ;;  %vm741_vm10 = vcmask 777216   ;;  %vm808_vm11 = vcmask 769024  }
  0x17   :  { %s920_s8 = sld [smem:[#allocation11 + $0xf]]  ;;  %s1058_s21 = smov 111  }
  0x18   :  { %s905_s9 = sld [smem:[#allocation11 + $0x2]]  ;;  %s1059_s26 = smov 110  }
  0x19   :  { %s906_s10 = sld [smem:[#allocation11 + $0xb]]  ;;  %s1060_s27 = smov 95  }
  0x1a   :  { %v71_v2 = vld.sshfl [vmem:[#allocation1 + $0x10] sm:$0xff pattern:$0x75316420]  ;;  %v72_v3 = vld.sshfl [vmem:[#allocation1 + $0x18] sm:$0xff pattern:$0x75316420] }
  0x1b   :  { %v92_v4 = vsel %vm77_vm0, %v71_v2, -inf  ;;  %v99_v5 = vsel %vm77_vm0, %v72_v3, -inf  ;;  %110 = vst [vmem:[#allocation1 + $0x10] ss:$2 sm:$0xff] %v63_v0  ;;  %s911_s11 = sld [smem:[#allocation11 + $0x4]]  ;;  %s1061_s28 = smov 94  }
  0x1c   :  { %v93_v6 = vrot.slane %v92_v4, 4  ;;  %v100_v7 = vrot.slane %v99_v5, 4  ;;  %v67_v8 = vld.sshfl [vmem:[#allocation1] sm:$0xff pattern:$0x75316420]  ;;  %s912_s12 = sld [smem:[#allocation11 + $0xd]] }
  0x1d   :  { %v68_v9 = vld.sshfl [vmem:[#allocation1 + $0x8] sm:$0xff pattern:$0x75316420]  ;;  %v78_v10 = vsel %vm77_vm0, %v67_v8, -inf  ;;  %s915_s15 = sld [smem:[#allocation11 + $0x5]] }
  0x1e   :  { %v94_v11 = vmax.f32 %v92_v4, %v93_v6  ;;  %v101_v12 = vmax.f32 %v99_v5, %v100_v7  ;;  %v79_v13 = vrot.slane %v78_v10, 4  ;;  %v85_v14 = vsel %vm77_vm0, %v68_v9, -inf  ;;  %106 = vst [vmem:[#allocation1] ss:$2 sm:$0xff] %v62_v1  ;;  %s916_s16 = sld [smem:[#allocation11 + $0xe]] }
  0x1f   :  { %v86_v15 = vrot.slane %v85_v14, 4  ;;  %s921_s18 = sld [smem:[#allocation11 + $0x7]] }
  0x20   :  { %v95_v16 = vrot.slane %v94_v11, 2  ;;  %v102_v17 = vrot.slane %v101_v12, 2  ;;  %v80_v18 = vmax.f32 %v78_v10, %v79_v13  ;;  %s922_s19 = sld [smem:[#allocation11 + $0x10]] }
  0x21   :  { %v87_v19 = vmax.f32 %v85_v14, %v86_v15  ;;  %s1280_s22 = sld [smem:[#allocation11 + $0x8]] }
  0x22   :  { %v96_v20 = vmax.f32 %v94_v11, %v95_v16  ;;  %v103_v21 = vmax.f32 %v101_v12, %v102_v17  ;;  %v81_v22 = vrot.slane %v80_v18, 2  ;;  %v111_v23 = vld.sshfl [vmem:[#allocation1 + $0x10] sm:$0xff pattern:$0x75316420]  ;;  %s1290_s23 = sld [smem:[#allocation11 + $0x11]] }
  0x23   :  { %v88_v25 = vrot.slane %v87_v19, 2  ;;  %v112_v26 = vld.sshfl [vmem:[#allocation1 + $0x18] sm:$0xff pattern:$0x75316420]  ;;  %v131_v27 = vsel %vm77_vm0, %v111_v23, 0.0  ;;  %s1307_s24 = sld [smem:[#allocation11]] }
  0x24   :  { %v97_v28 = vrot.slane %v96_v20, 1  ;;  %v104_v29 = vrot.slane %v103_v21, 1  ;;  %v82_v30 = vmax.f32 %v80_v18, %v81_v22  ;;  %v132_v31 = vrot.slane %v131_v27, 4  ;;  %s1322_s25 = sld [smem:[#allocation11 + $0x9]] }
  0x25   :  { %v89_v32 = vmax.f32 %v87_v19, %v88_v25  ;;  %v138_v33 = vsel %vm77_vm0, %v112_v26, 0.0  ;;  %v107_v34 = vld.sshfl [vmem:[#allocation1] sm:$0xff pattern:$0x75316420] }
  0x26   :  { %v98_v35 = vmax.f32 %v96_v20, %v97_v28  ;;  %v105_v36 = vmax.f32 %v103_v21, %v104_v29  ;;  %v83_v37 = vrot.slane %v82_v30, 1  ;;  %v133_v38 = vadd.f32 %v132_v31, %v131_v27  ;;  %v108_v39 = vld.sshfl [vmem:[#allocation1 + $0x8] sm:$0xff pattern:$0x75316420] }
  0x27   :  { %v90_v40 = vrot.slane %v89_v32, 1  ;;  %v139_v41 = vrot.slane %v138_v33, 4  ;;  %v117_v42 = vsel %vm77_vm0, %v107_v34, 0.0  ;;  %v124_v43 = vsel %vm77_vm0, %v108_v39, 0.0 }
  0x28   :  { %v154_v44 = vrot.slane %v105_v36, 7  ;;  %v134_v46 = vrot.slane %v133_v38, 2  ;;  %v118_v47 = vrot.slane %v117_v42, 4  ;;  %v84_v48 = vmax.f32 %v82_v30, %v83_v37 }
  0x29   :  { %v91_v49 = vmax.f32 %v89_v32, %v90_v40  ;;  %v140_v50 = vadd.f32 %v139_v41, %v138_v33  ;;  %v125_v51 = vrot.slane %v124_v43, 4  ;;  %v1137_v32 = vstv %s910_s2 }
  0x2a   :  { %v157_v52 = vsel %vm155_vm1, %v98_v35, %v154_v44  ;;  %v135_v53 = vadd.f32 %v134_v46, %v133_v38  ;;  %v119_v54 = vadd.f32 %v118_v47, %v117_v42  ;;  %v1139_v33 = vstv %s902_s30 }
  0x2b   :  { %165 = vst.msk [vmem:[#allocation2 + $0x2] sm:$0x3] %vm1107_vm2, %v157_v52  ;;  %v153_v55 = vrot.slane %v91_v49, 7  ;;  %v141_v56 = vrot.slane %v140_v50, 2  ;;  %v126_v57 = vadd.f32 %v125_v51, %v124_v43  ;;  %v1151_v38 = vstv %s909_s5  ;;  %s885_s5 = sshll.u32 %s1617_s4, 4  ;;  %s886_s5 = int_to_ptr.hbm [resolvable:$true] %s885_s5 }
  0x2c   :  { %v120_v58 = vrot.slane %v119_v54, 2  ;;  %v136_v60 = vrot.slane %v135_v53, 1  ;;  %v1153_v39 = vstv %s901_s6  ;;  %v1165_v47 = vstv %s919_s7  ;;  %s1063_s6 = smov 32   ;;  %s1064_s7 = smov 2  }
  0x2d   :  { %v156_v59 = vsel %vm155_vm1, %v84_v48, %v153_v55  ;;  %v142_v61 = vadd.f32 %v141_v56, %v140_v50  ;;  %v127_v62 = vrot.slane %v126_v57, 2  ;;  %v1167_v48 = vstv %s920_s8 }
  0x2e   :  { %164 = vst.msk [vmem:[#allocation2] sm:$0x3] %vm1107_vm2, %v156_v59  ;;  %v121_v63 = vadd.f32 %v120_v58, %v119_v54  ;;  %v137_v3 = vadd.f32 %v136_v60, %v135_v53  ;;  %v1174_v51 = vstv %s905_s9  ;;  %v1176_v52 = vstv %s906_s10 }
  0x2f   :  { %v143_v0 = vrot.slane %v142_v61, 1  ;;  %v128_v1 = vadd.f32 %v127_v62, %v126_v57 }
  0x30   :  { %v122_v2 = vrot.slane %v121_v63, 1 }
  0x31   :  { %v144_v4 = vadd.f32 %v143_v0, %v142_v61  ;;  %v129_v5 = vrot.slane %v128_v1, 1 }
  0x32   :  { %v223_v6 = vld [vmem:[#allocation2 + $0x2] sm:$0x3]  ;;  %v123_v9 = vadd.f32 %v122_v2, %v121_v63  ;;  %v1198_v2 = vstv %s912_s12 }
  0x33   :  { %v232_v7 = vperm.slane %v223_v6, 0  ;;  %v171_v8 = vrot.slane %v144_v4, 7  ;;  %v130_v10 = vadd.f32 %v129_v5, %v128_v1  ;;  %v233_v16 = vperm.slane %v223_v6, 1 }
  0x34   :  { %v1196_v1 = vstv %s911_s11 }
  0x35   :  { %238 = vrot.lane.b32.xlu1 %v232_v7, %s1053_s1  ;;  %v222_v11 = vld [vmem:[#allocation2] sm:$0x3]  ;;  %v173_v12 = vsel %vm155_vm1, %v137_v3, %v171_v8  ;;  %v170_v13 = vrot.slane %v130_v10, 7 }
  0x36   :  { %v230_v14 = vperm.slane %v222_v11, 0  ;;  %177 = vst.msk [vmem:[#allocation3 + $0x2] sm:$0x3] %vm1107_vm2, %v173_v12  ;;  %v231_v17 = vperm.slane %v222_v11, 1 }
  0x37   :  { %v172_v15 = vsel %vm155_vm1, %v123_v9, %v170_v13 }
  0x38   :  { %234 = vrot.lane.b32.xlu0 %v230_v14, %s1053_s1  ;;  %176 = vst.msk [vmem:[#allocation3] sm:$0x3] %vm1107_vm2, %v172_v15 }
  0x3d   :  { %240 = vrot.lane.b32.xlu1 %v233_v16, %s1053_s1  ;;  %v225_v18 = vld [vmem:[#allocation3 + $0x2] sm:$0x3]  ;;  %v1221_v16 = vstv %s916_s16 }
  0x3e   :  { %v227_v19 = vmul.f32 0.25, %v225_v18 }
  0x3f   :  { %v224_v20 = vld [vmem:[#allocation3] sm:$0x3] }
  0x40   :  { %236 = vrot.lane.b32.xlu0 %v231_v17, %s1053_s1  ;;  %v226_v21 = vmul.f32 0.25, %v224_v20  ;;  %v260_v22 = vperm.slane %v227_v19, 1  ;;  %v259_v24 = vperm.slane %v227_v19, 0  ;;  %v1226_v19 = vstv %s915_s15 }
  0x42   :  { %v257_v23 = vperm.slane %v226_v21, 0  ;;  %v258_v25 = vperm.slane %v226_v21, 1  ;;  %v1230_v21 = vstv %s921_s18 }
  0x44   :  { %261 = vrot.lane.b32.xlu2 %v257_v23, %s1053_s1 }
  0x45   :  { %267 = vrot.lane.b32.xlu1 %v260_v22, %s1053_s1  ;;  %v1232_v22 = vstv %s922_s19 }
  0x48   :  { %265 = vrot.lane.b32.xlu0 %v259_v24, %s1053_s1 }
  0x4c   :  { %263 = vrot.lane.b32.xlu2 %v258_v25, %s1053_s1 }
  0x9e   :  { %v1123_v26 = vpop.permute.xlu2 %261 }
  0x9f   :  { %v1217_v12 = vsel %vm242_vm3, 0.0, %v1123_v26 }
  0xa0   :  { %v458_v23 = vmul.f32 %v1137_v32, %v1217_v12  ;;  %v324_v24 = vmul.f32 %v1139_v33, %v1217_v12 }
  0xa6   :  { %v1129_v29 = vpop.permute.xlu2 %263 }
  0xa7   :  { %v1125_v27 = vpop.permute.xlu1 %238  ;;  %v1133_v30 = vsel %vm242_vm3, %v1129_v29, 0.0  ;;  %v1241_v25 = vsel %vm242_vm3, %v1123_v26, %v1129_v29 }
  0xa8   :  { %v460_v35 = vmul.f32 %v1137_v32, %v1133_v30  ;;  %v326_v36 = vmul.f32 %v1139_v33, %v1133_v30  ;;  %v649_v58 = vmul.f32 %v1167_v48, %v1133_v30  ;;  %v515_v5 = vmul.f32 %v1198_v2, %v1133_v30 }
  0xa9   :  { %v393_v10 = vmul.f32 %v1176_v52, %v1133_v30  ;;  %v582_v29 = vmul.f32 %v1221_v16, %v1133_v30 }
  0xaa   :  { %v1127_v28 = vpop.permute.xlu0 %234 }
  0xaf   :  { %v1135_v31 = vpop.permute.xlu1 %240 }
  0xb0   :  { %v1161_v42 = vsel %vm242_vm3, %v1135_v31, 0.0 }
  0xb1   :  { %v456_v53 = vmul.f32 %v1151_v38, %v1161_v42  ;;  %v389_v55 = vmul.f32 %v1174_v51, %v1161_v42  ;;  %v322_v3 = vmul.f32 %v1153_v39, %v1161_v42  ;;  %v645_v6 = vmul.f32 %v1165_v47, %v1161_v42 }
  0xb2   :  { %v1141_v34 = vpop.permute.xlu0 %236  ;;  %v511_v18 = vmul.f32 %v1196_v1, %v1161_v42 }
  0xb3   :  { %v1149_v37 = vsel %vm242_vm3, %v1141_v34, 0.0 }
  0xb4   :  { %v453_v40 = vmul.f32 %v1151_v38, %v1149_v37  ;;  %v319_v41 = vmul.f32 %v1153_v39, %v1149_v37  ;;  %v642_v57 = vmul.f32 %v1165_v47, %v1149_v37  ;;  %v508_v4 = vmul.f32 %v1196_v1, %v1149_v37 }
  0xb5   :  { %v386_v9 = vmul.f32 %v1174_v51, %v1149_v37  ;;  %v575_v26 = vmul.f32 %v1226_v19, %v1149_v37 }
  0xb6   :  { %v466_v43 = vadd.f32 %v460_v35, %v453_v40  ;;  %v332_v44 = vadd.f32 %v326_v36, %v319_v41  ;;  %v655_v61 = vadd.f32 %v649_v58, %v642_v57  ;;  %v521_v11 = vadd.f32 %v515_v5, %v508_v4 }
  0xb7   :  { %v1163_v46 = vpop.permute.xlu1 %267  ;;  %v399_v15 = vadd.f32 %v393_v10, %v386_v9  ;;  %v1246_v35 = vsel %vm242_vm3, %v1127_v28, %v1141_v34  ;;  %v578_v40 = vmul.f32 %v1226_v19, %v1161_v42  ;;  %v1253_v41 = vsel %vm242_vm3, 0.0, %v1125_v27 }
  0xb8   :  { %482 = vrot.lane.b32.xlu2 %v466_v43, %s1054_s13  ;;  %v1172_v49 = vsel %vm242_vm3, %v1163_v46, 0.0  ;;  %v347_v50 = vrot.slane %v332_v44, 7  ;;  %v536_v17 = vrot.slane %v521_v11, 7  ;;  %v1261_v34 = vsel %vm242_vm3, 0.0, %v1127_v28 }
  0xb9   :  { %v463_v54 = vmul.f32 %v1137_v32, %v1172_v49  ;;  %v396_v56 = vmul.f32 %v1176_v52, %v1172_v49  ;;  %v329_v63 = vmul.f32 %v1139_v33, %v1172_v49  ;;  %v652_v0 = vmul.f32 %v1167_v48, %v1172_v49 }
  0xba   :  { %352 = vrot.lane.b32.xlu0 %v347_v50, %s1055_s14  ;;  %v518_v14 = vmul.f32 %v1198_v2, %v1172_v49  ;;  %v585_v20 = vmul.f32 %v1221_v16, %v1172_v49  ;;  %v414_v43 = vrot.slane %v399_v15, 6  ;;  %v1265_v50 = vmul.f32 %v1167_v48, %v1217_v12  ;;  %v266_v57 = vpop.permute.xlu0 %265 }
  0xbb   :  { %v469_v59 = vadd.f32 %v463_v54, %v456_v53  ;;  %v402_v60 = vadd.f32 %v396_v56, %v389_v55  ;;  %v335_v7 = vadd.f32 %v329_v63, %v322_v3  ;;  %v658_v8 = vadd.f32 %v652_v0, %v645_v6 }
  0xbc   :  { %v524_v36 = vadd.f32 %v518_v14, %v511_v18  ;;  %v591_v44 = vadd.f32 %v585_v20, %v578_v40  ;;  %v1269_v53 = vmul.f32 %v1198_v2, %v1217_v12  ;;  %v704_v54 = vmul.f32 %v1232_v22, %v1133_v30 }
  0xbd   :  { %486 = vrot.lane.b32.xlu1 %v469_v59, %s1054_s13  ;;  %v416_v62 = vrot.slane %v402_v60, 6  ;;  %v349_v13 = vrot.slane %v335_v7, 7  ;;  %v452_v55 = vmul.f32 %v1151_v38, %v1246_v35  ;;  %v459_v28 = vmul.f32 %v1137_v32, %v1241_v25 }
  0xbe   :  { %v325_v56 = vmul.f32 %v1139_v33, %v1241_v25  ;;  %v538_v58 = vrot.slane %v524_v36, 7  ;;  %v707_v59 = vmul.f32 %v1232_v22, %v1172_v49  ;;  %v318_v60 = vmul.f32 %v1153_v39, %v1246_v35 }
  0xbf   :  { %v697_v63 = vmul.f32 %v1230_v21, %v1149_v37  ;;  %v451_v0 = vmul.f32 %v1151_v38, %v1261_v34  ;;  %v648_v3 = vmul.f32 %v1167_v48, %v1241_v25  ;;  %v605_v4 = vrot.slane %v591_v44, 6 }
  0xc0   :  { %671 = vrot.lane.b32.xlu2 %v655_v61, %s1056_s17  ;;  %v1288_v61 = vmul.f32 %v1151_v38, %v1253_v41  ;;  %v700_v5 = vmul.f32 %v1230_v21, %v1161_v42  ;;  %v317_v6 = vmul.f32 %v1153_v39, %v1261_v34  ;;  %v1305_v7 = vmul.f32 %v1174_v51, %v1253_v41 }
  0xc1   :  { %v1316_v9 = vsel %vm242_vm3, %v266_v57, %v1163_v46  ;;  %v465_v10 = vadd.f32 %v459_v28, %v452_v55  ;;  %v1320_v11 = vmul.f32 %v1198_v2, %v1241_v25  ;;  %v331_v14 = vadd.f32 %v325_v56, %v318_v60 }
  0xc2   :  { %423 = vrot.lane.b32.xlu0 %v416_v62, %s1057_s20  ;;  %v588_v62 = vadd.f32 %v582_v29, %v575_v26  ;;  %v710_v15 = vadd.f32 %v704_v54, %v697_v63  ;;  %v1335_v18 = vmul.f32 %v1153_v39, %v1253_v41  ;;  %v330_v20 = vadd.f32 %v324_v24, %v317_v6 }
  0xc3   :  { %v462_v40 = vmul.f32 %v1137_v32, %v1316_v9  ;;  %v1344_v26 = vsel %vm242_vm3, 0.0, %v266_v57  ;;  %v1350_v44 = vstv %s1280_s22  ;;  %v1353_v54 = vstv %s1290_s23 }
  0xc4   :  { %v603_v46 = vrot.slane %v588_v62, 6  ;;  %v764_v55 = vmul.f32 %v1350_v44, %v1149_v37  ;;  %v725_v28 = vrot.slane %v710_v15, 7  ;;  %v641_v56 = vmul.f32 %v1165_v47, %v1246_v35 }
  0xc5   :  { %675 = vrot.lane.b32.xlu1 %v658_v8, %s1056_s17  ;;  %v1312_v8 = vsel %vm242_vm3, %v1125_v27, %v1135_v31  ;;  %v1327_v27 = vmul.f32 %v1165_v47, %v1261_v34  ;;  %v1331_v31 = vmul.f32 %v1196_v1, %v1261_v34  ;;  %v395_v57 = vmul.f32 %v1176_v52, %v1316_v9 }
  0xc6   :  { %v455_v36 = vmul.f32 %v1151_v38, %v1312_v8  ;;  %v644_v29 = vmul.f32 %v1165_v47, %v1312_v8  ;;  %v342_v38 = vrot.slane %v331_v14, 4  ;;  %v767_v37 = vmul.f32 %v1350_v44, %v1161_v42 }
  0xc7   :  { %v774_v62 = vmul.f32 %v1353_v54, %v1172_v49  ;;  %v651_v49 = vmul.f32 %v1167_v48, %v1316_v9  ;;  %v328_v15 = vmul.f32 %v1139_v33, %v1316_v9 }
  0xc8   :  { %356 = vrot.lane.b32.xlu2 %v349_v13, %s1055_s14  ;;  %v713_v13 = vadd.f32 %v707_v59, %v700_v5  ;;  %v461_v59 = vmul.f32 %v1137_v32, %v1344_v26  ;;  %v468_v60 = vadd.f32 %v462_v40, %v455_v36  ;;  %v291_v5 = vstv %s1322_s25 }
  0xc9   :  { %v394_v32 = vmul.f32 %v1176_v52, %v1344_v26  ;;  %v1379_v6 = vadd.f32 %v774_v62, %v767_v37  ;;  %v292_v14 = vmul.f32 %v291_v5, %v1217_v12 }
  0xca   :  { %541 = vrot.lane.b32.xlu0 %v536_v17, %s1058_s21  ;;  %v464_v17 = vadd.f32 %v458_v23, %v451_v0  ;;  %v476_v23 = vrot.slane %v465_v10, 4  ;;  %v727_v24 = vrot.slane %v713_v13, 7  ;;  %v654_v10 = vadd.f32 %v648_v3, %v641_v56 }
  0xcc   :  { %v478_v63 = vsel %vm77_vm0, %v464_v17, %v476_v23  ;;  %v293_v17 = vmul.f32 %v291_v5, %v1241_v25  ;;  %v321_v23 = vmul.f32 %v1153_v39, %v1312_v8 }
  0xcd   :  { %419 = vrot.lane.b32.xlu1 %v414_v43, %s1057_s20  ;;  %v388_v43 = vmul.f32 %v1174_v51, %v1312_v8 }
  0xce   :  { %v334_v37 = vadd.f32 %v328_v15, %v321_v23 }
  0xcf   :  { %v401_v13 = vadd.f32 %v395_v57, %v388_v43  ;;  %v294_v43 = vmul.f32 %v291_v5, %v1344_v26  ;;  %v507_v57 = vmul.f32 %v1196_v1, %v1246_v35 }
  0xd0   :  { %545 = vrot.lane.b32.xlu2 %v538_v58, %s1058_s21  ;;  %v771_v58 = vmul.f32 %v1353_v54, %v1133_v30  ;;  %v344_v30 = vsel %vm77_vm0, %v330_v20, %v342_v38 }
  0xd1   :  { %v346_v36 = vrot.slane %v344_v30, 7  ;;  %v410_v56 = vrot.slane %v401_v13, 4  ;;  %v400_v30 = vadd.f32 %v394_v32, %v1305_v7  ;;  %v650_v7 = vmul.f32 %v1167_v48, %v1344_v26 }
  0xd2   :  { %612 = vrot.lane.b32.xlu0 %v605_v4, %s1059_s26  ;;  %v1371_v0 = vadd.f32 %v771_v58, %v764_v55  ;;  %v286_v4 = vstv %s1307_s24  ;;  %v295_v55 = vmul.f32 %v291_v5, %v1316_v9  ;;  %v385_v5 = vmul.f32 %v1174_v51, %v1246_v35 }
  0xd3   :  { %v287_v42 = vmul.f32 %v286_v4, %v1261_v34  ;;  %v288_v20 = vmul.f32 %v286_v4, %v1246_v35  ;;  %v289_v3 = vmul.f32 %v286_v4, %v1253_v41  ;;  %v290_v38 = vmul.f32 %v286_v4, %v1312_v8 }
  0xd4   :  { %v657_v4 = vadd.f32 %v651_v49, %v644_v29  ;;  %v412_v13 = vsel %vm77_vm0, %v400_v30, %v410_v56  ;;  %v520_v29 = vadd.f32 %v1320_v11, %v507_v57  ;;  %v392_v32 = vmul.f32 %v1176_v52, %v1241_v25 }
  0xd5   :  { %608 = vrot.lane.b32.xlu1 %v603_v46, %s1059_s26  ;;  %v477_v46 = vrot.slane %v468_v60, 4  ;;  %v296_v40 = vadd.f32 %v292_v14, %v287_v42  ;;  %v298_v58 = vadd.f32 %v294_v43, %v289_v3  ;;  %v665_v60 = vrot.slane %v654_v10, 4 }
  0xd6   :  { %v643_v14 = vmul.f32 %v1165_v47, %v1253_v41  ;;  %v666_v48 = vrot.slane %v657_v4, 4  ;;  %v391_v11 = vmul.f32 %v1176_v52, %v1217_v12  ;;  %v415_v15 = vrot.slane %v412_v13, 6 }
  0xd7   :  { %v531_v3 = vrot.slane %v520_v29, 4  ;;  %v584_v43 = vmul.f32 %v1221_v16, %v1316_v9  ;;  %v519_v47 = vadd.f32 %v1269_v53, %v1331_v31  ;;  %v581_v57 = vmul.f32 %v1221_v16, %v1241_v25 }
  0xd8   :  { %734 = vrot.lane.b32.xlu2 %v727_v24, %s1060_s27  ;;  %v297_v24 = vadd.f32 %v293_v17, %v288_v20  ;;  %v384_v20 = vmul.f32 %v1174_v51, %v1261_v34  ;;  %v577_v51 = vmul.f32 %v1226_v19, %v1312_v8 }
  0xd9   :  { %v533_v53 = vsel %vm77_vm0, %v519_v47, %v531_v3 }
  0xda   :  { %730 = vrot.lane.b32.xlu0 %v725_v28, %s1060_s27  ;;  %v467_v28 = vadd.f32 %v461_v59, %v1288_v61  ;;  %v304_v62 = vrot.slane %v297_v24, 4  ;;  %v653_v61 = vadd.f32 %v1265_v50, %v1327_v27  ;;  %v327_v59 = vmul.f32 %v1139_v33, %v1344_v26 }
  0xdb   :  { %v343_v50 = vrot.slane %v334_v37, 4  ;;  %v517_v33 = vmul.f32 %v1198_v2, %v1316_v9  ;;  %v590_v56 = vadd.f32 %v584_v43, %v577_v51  ;;  %v706_v37 = vmul.f32 %v1232_v22, %v1316_v9 }
  0xdc   :  { %v479_v39 = vsel %vm77_vm0, %v467_v28, %v477_v46  ;;  %v1410_v42 = vsel %vm77_vm0, %v296_v40, %v304_v62  ;;  %v667_v49 = vsel %vm77_vm0, %v653_v61, %v665_v60  ;;  %v398_v46 = vadd.f32 %v392_v32, %v385_v5 }
  0xdd   :  { %480 = vrot.lane.b32.xlu1 %v478_v63, %s1054_s13  ;;  %v299_v63 = vadd.f32 %v295_v55, %v290_v38  ;;  %v333_v17 = vadd.f32 %v327_v59, %v1335_v18  ;;  %v656_v40 = vadd.f32 %v650_v7, %v643_v14  ;;  %v574_v38 = vmul.f32 %v1226_v19, %v1246_v35 }
  0xde   :  { %v409_v24 = vrot.slane %v398_v46, 4  ;;  %v397_v55 = vadd.f32 %v391_v11, %v384_v20  ;;  %v516_v28 = vmul.f32 %v1198_v2, %v1344_v26  ;;  %v583_v2 = vmul.f32 %v1221_v16, %v1344_v26 }
  0xdf   :  { %v305_v10 = vrot.slane %v299_v63, 4  ;;  %v345_v52 = vsel %vm77_vm0, %v333_v17, %v343_v50  ;;  %v668_v18 = vsel %vm77_vm0, %v656_v40, %v666_v48  ;;  %v580_v63 = vmul.f32 %v1221_v16, %v1217_v12 }
  0xe0   :  { %350 = vrot.lane.b32.xlu2 %v346_v36, %s1055_s14  ;;  %v510_v36 = vmul.f32 %v1196_v1, %v1312_v8  ;;  %v348_v31 = vrot.slane %v345_v52, 7  ;;  %v411_v62 = vsel %vm77_vm0, %v397_v55, %v409_v24  ;;  %v535_v30 = vrot.slane %v533_v53, 7 }
  0xe1   :  { %v1422_v27 = vsel %vm77_vm0, %v298_v58, %v305_v10  ;;  %v509_v58 = vmul.f32 %v1196_v1, %v1253_v41  ;;  %v573_v1 = vmul.f32 %v1226_v19, %v1261_v34  ;;  %v699_v5 = vmul.f32 %v1230_v21, %v1312_v8 }
  0xe2   :  { %484 = vrot.lane.b32.xlu0 %v479_v39, %s1054_s13  ;;  %v523_v23 = vadd.f32 %v517_v33, %v510_v36  ;;  %v587_v39 = vadd.f32 %v581_v57, %v574_v38  ;;  %v576_v61 = vmul.f32 %v1226_v19, %v1253_v41  ;;  %v599_v59 = vrot.slane %v590_v56, 4 }
  0xe3   :  { %v522_v4 = vadd.f32 %v516_v28, %v509_v58  ;;  %v696_v10 = vmul.f32 %v1230_v21, %v1246_v35  ;;  %v413_v13 = vrot.slane %v411_v62, 6  ;;  %v712_v7 = vadd.f32 %v706_v37, %v699_v5 }
  0xe4   :  { %v532_v60 = vrot.slane %v523_v23, 4  ;;  %v589_v29 = vadd.f32 %v583_v2, %v576_v61  ;;  %v598_v32 = vrot.slane %v587_v39, 4  ;;  %v763_v50 = vmul.f32 %v1350_v44, %v1246_v35 }
  0xe5   :  { %669 = vrot.lane.b32.xlu1 %v667_v49, %s1056_s17  ;;  %v703_v49 = vmul.f32 %v1232_v22, %v1241_v25  ;;  %v586_v19 = vadd.f32 %v580_v63, %v573_v1  ;;  %v705_v33 = vmul.f32 %v1232_v22, %v1344_v26  ;;  %v770_v46 = vmul.f32 %v1353_v54, %v1241_v25 }
  0xe6   :  { %v534_v16 = vsel %vm77_vm0, %v522_v4, %v532_v60  ;;  %v601_v14 = vsel %vm77_vm0, %v589_v29, %v599_v59  ;;  %v721_v17 = vrot.slane %v712_v7, 4  ;;  %v695_v20 = vmul.f32 %v1230_v21, %v1261_v34  ;;  %v1529_v29 = vld [vmem:[#allocation9] sm:$0x77] }
  0xe7   :  { %v537_v48 = vrot.slane %v534_v16, 7  ;;  %v709_v11 = vadd.f32 %v703_v49, %v696_v10  ;;  %v600_v35 = vsel %vm77_vm0, %v586_v19, %v598_v32  ;;  %v702_v36 = vmul.f32 %v1232_v22, %v1217_v12 }
  0xe8   :  { %421 = vrot.lane.b32.xlu2 %v415_v15, %s1057_s20  ;;  %v698_v15 = vmul.f32 %v1230_v21, %v1253_v41  ;;  %v776_v40 = vadd.f32 %v770_v46, %v763_v50  ;;  %v604_v3 = vrot.slane %v601_v14, 6  ;;  %v762_v25 = vmul.f32 %v1350_v44, %v1261_v34 }
  0xe9   :  { %v720_v47 = vrot.slane %v709_v11, 4  ;;  %v769_v52 = vmul.f32 %v1353_v54, %v1217_v12  ;;  %v773_v23 = vmul.f32 %v1353_v54, %v1316_v9  ;;  %v708_v24 = vadd.f32 %v702_v36, %v695_v20 }
  0xea   :  { %673 = vrot.lane.b32.xlu0 %v668_v18, %s1056_s17  ;;  %v711_v43 = vadd.f32 %v705_v33, %v698_v15  ;;  %v602_v18 = vrot.slane %v600_v35, 6  ;;  %v787_v22 = vrot.slane %v776_v40, 4  ;;  %v766_v51 = vmul.f32 %v1350_v44, %v1312_v8 }
  0xeb   :  { %v722_v34 = vsel %vm77_vm0, %v708_v24, %v720_v47  ;;  %v775_v55 = vadd.f32 %v769_v52, %v762_v25  ;;  %v772_v28 = vmul.f32 %v1353_v54, %v1344_v26  ;;  %v792_v60 = vrot.slane %v1371_v0, 6 }
  0xec   :  { %v723_v21 = vsel %vm77_vm0, %v711_v43, %v721_v17  ;;  %v779_v12 = vadd.f32 %v773_v23, %v766_v51  ;;  %v724_v53 = vrot.slane %v722_v34, 7  ;;  %v794_v26 = vrot.slane %v1379_v6, 6 }
  0xed   :  { %354 = vrot.lane.b32.xlu1 %v348_v31, %s1055_s14  ;;  %v726_v38 = vrot.slane %v723_v21, 7  ;;  %v789_v9 = vsel %vm77_vm0, %v775_v55, %v787_v22  ;;  %v765_v31 = vmul.f32 %v1350_v44, %v1253_v41  ;;  %v310_v33 = vmul.f32 %v1410_v42, %v1529_v29 }
  0xee   :  { %v788_v56 = vrot.slane %v779_v12, 4  ;;  %v791_v8 = vrot.slane %v789_v9, 6  ;;  %v311_v11 = vmul.f32 %v1422_v27, %v1529_v29  ;;  %v283_v46 = vstv %s1616_s3  ;;  %s1062_s3 = smov [#allocation12]  }
  0xef   :  { %v778_v57 = vadd.f32 %v772_v28, %v765_v31  ;;  %v312_v20 = vadd.f32 %v310_v33, %v283_v46  ;;  %s883_s1 = sshll.u32 %s1062_s3, 4  ;;  %s884_s1 = int_to_ptr.vmem [resolvable:$true] %s883_s1 }
  0xf0   :  { %539 = vrot.lane.b32.xlu2 %v535_v30, %s1058_s21 }
  0xf1   :  { %v790_v58 = vsel %vm77_vm0, %v778_v57, %v788_v56 }
  0xf2   :  { %417 = vrot.lane.b32.xlu0 %v413_v13, %s1057_s20  ;;  %v793_v37 = vrot.slane %v790_v58, 6 }
  0xf5   :  { %543 = vrot.lane.b32.xlu1 %v537_v48, %s1058_s21 }
  0xf8   :  { %610 = vrot.lane.b32.xlu2 %v604_v3, %s1059_s26  ;;  %v313_v3 = vadd.f32 %v311_v11, %v283_v46 }
  0xfa   :  { %606 = vrot.lane.b32.xlu0 %v602_v18, %s1059_s26 }
  0xfd   :  { %732 = vrot.lane.b32.xlu1 %v726_v38, %s1060_s27 }
 0x100   :  { %728 = vrot.lane.b32.xlu2 %v724_v53, %s1060_s27 }
 0x102   :  { %795 = vrot.lane.b32.xlu0 %v791_v8, %s1061_s28 }
 0x105   :  { %797 = vrot.lane.b32.xlu1 %v792_v60, %s1061_s28 }
 0x108   :  { %799 = vrot.lane.b32.xlu2 %v793_v37, %s1061_s28 }
 0x10a   :  { %801 = vrot.lane.b32.xlu0 %v794_v26, %s1061_s28 }
 0x112   :  { %v1511_v54 = vpop.permute.xlu2 %482 }
 0x113   :  { %v489_v42 = vrot.slane %v1511_v54, 4 }
 0x11a   :  { %v1513_v41 = vpop.permute.xlu2 %671 }
 0x11b   :  { %v678_v52 = vrot.slane %v1513_v41, 4 }
 0x122   :  { %v357_v44 = vpop.permute.xlu2 %356 }
 0x123   :  { %v361_v43 = vrot.slane %v357_v44, 4 }
 0x12a   :  { %v1515_v2 = vpop.permute.xlu2 %545 }
 0x12b   :  { %v550_v23 = vrot.slane %v1515_v2, 4 }
 0x12c   :  { %v353_v62 = vpop.permute.xlu0 %352 }
 0x12d   :  { %v359_v50 = vrot.slane %v353_v62, 4 }
 0x12f   :  { %v487_v63 = vpop.permute.xlu1 %486 }
 0x130   :  { %v491_v21 = vrot.slane %v487_v63, 4 }
 0x132   :  { %v1517_v30 = vpop.permute.xlu2 %734 }
 0x134   :  { %v424_v39 = vpop.permute.xlu0 %423 }
 0x135   :  { %v428_v14 = vrot.slane %v424_v39, 4 }
 0x137   :  { %v1519_v4 = vpop.permute.xlu1 %675 }
 0x138   :  { %v680_v58 = vrot.slane %v1519_v4, 4 }
 0x13a   :  { %v351_v5 = vpop.permute.xlu2 %350 }
 0x13b   :  { %v358_v32 = vrot.slane %v351_v5, 4 }
 0x13c   :  { %v542_v0 = vpop.permute.xlu0 %541 }
 0x13d   :  { %v362_v48 = vsel %vm77_vm0, %v358_v32, %v359_v50  ;;  %v548_v12 = vrot.slane %v542_v0, 4 }
 0x13e   :  { %v364_v35 = vsel %vm363_vm4, %v351_v5, %v362_v48 }
 0x13f   :  { %v1521_v1 = vpop.permute.xlu1 %419  ;;  %v369_v18 = vmul.f32 %v364_v35, %v1529_v29 }
 0x140   :  { %v426_v8 = vrot.slane %v1521_v1, 4 }
 0x141   :  { %v903_v56 = vrot.slane %v369_v18, 9 }
 0x142   :  { %v422_v59 = vpop.permute.xlu2 %421 }
 0x143   :  { %v427_v19 = vrot.slane %v422_v59, 4  ;;  %v379_v4 = vadd.f32 %v903_v56, %v312_v20 }
 0x144   :  { %v613_v6 = vpop.permute.xlu0 %612 }
 0x145   :  { %v432_v17 = vsel %vm77_vm0, %v427_v19, %v428_v14  ;;  %v617_v9 = vrot.slane %v613_v6, 4 }
 0x146   :  { %v433_v27 = vsel %vm430_vm5, %v422_v59, %v432_v17 }
 0x147   :  { %v1523_v61 = vpop.permute.xlu1 %608  ;;  %v437_v34 = vmul.f32 %v433_v27, %v1529_v29 }
 0x148   :  { %v615_v33 = vrot.slane %v1523_v61, 4 }
 0x149   :  { %v908_v54 = vrot.slane %v437_v34, 10 }
 0x14a   :  { %v540_v7 = vpop.permute.xlu2 %539 }
 0x14b   :  { %v547_v24 = vrot.slane %v540_v7, 4 }
 0x14c   :  { %v1525_v10 = vpop.permute.xlu0 %730 }
 0x14d   :  { %v551_v60 = vsel %vm77_vm0, %v547_v24, %v548_v12 }
 0x14e   :  { %v553_v5 = vsel %vm552_vm6, %v540_v7, %v551_v60 }
 0x14f   :  { %v1527_v13 = vpop.permute.xlu1 %480  ;;  %v558_v20 = vmul.f32 %v553_v5, %v1529_v29 }
 0x150   :  { %v488_v38 = vrot.slane %v1527_v13, 4 }
 0x151   :  { %v913_v34 = vrot.slane %v558_v20, 9 }
 0x152   :  { %v611_v36 = vpop.permute.xlu2 %610  ;;  %v492_v41 = vsel %vm77_vm0, %v488_v38, %v489_v42 }
 0x153   :  { %v616_v22 = vrot.slane %v611_v36, 4  ;;  %v494_v32 = vsel %vm493_vm7, %v1527_v13, %v492_v41 }
 0x154   :  { %v485_v16 = vpop.permute.xlu0 %484 }
 0x155   :  { %v490_v47 = vrot.slane %v485_v16, 4  ;;  %v621_v37 = vsel %vm77_vm0, %v616_v22, %v617_v9 }
 0x156   :  { %v622_v6 = vsel %vm619_vm8, %v611_v36, %v621_v37  ;;  %v499_v36 = vmul.f32 %v494_v32, %v1529_v29 }
 0x157   :  { %v1531_v49 = vpop.permute.xlu1 %669  ;;  %v495_v28 = vsel %vm77_vm0, %v490_v47, %v491_v21  ;;  %v626_v46 = vmul.f32 %v622_v6, %v1529_v29  ;;  %v737_v21 = vrot.slane %v1525_v10, 4 }
 0x158   :  { %v496_v44 = vsel %vm493_vm7, %v485_v16, %v495_v28  ;;  %v677_v14 = vrot.slane %v1531_v49, 4  ;;  %v739_v28 = vrot.slane %v1517_v30, 4 }
 0x159   :  { %v500_v16 = vmul.f32 %v496_v44, %v1529_v29  ;;  %v918_v24 = vrot.slane %v626_v46, 10 }
 0x15a   :  { %v729_v48 = vpop.permute.xlu2 %728  ;;  %v681_v27 = vsel %vm77_vm0, %v677_v14, %v678_v52 }
 0x15b   :  { %v683_v52 = vsel %vm682_vm9, %v1531_v49, %v681_v27 }
 0x15c   :  { %v1541_v15 = vpop.permute.xlu0 %673 }
 0x15d   :  { %v679_v63 = vrot.slane %v1541_v15, 4 }
 0x15f   :  { %v355_v40 = vpop.permute.xlu1 %354  ;;  %v684_v17 = vsel %vm77_vm0, %v679_v63, %v680_v58 }
 0x160   :  { %v360_v25 = vrot.slane %v355_v40, 4  ;;  %v685_v47 = vsel %vm682_vm9, %v1541_v15, %v684_v17 }
 0x161   :  { %v689_v12 = vmul.f32 %v685_v47, %v1529_v29 }
 0x162   :  { %v365_v51 = vsel %vm77_vm0, %v360_v25, %v361_v43  ;;  %v800_v44 = vpop.permute.xlu2 %799 }
 0x163   :  { %v366_v55 = vsel %vm363_vm4, %v355_v40, %v365_v51 }
 0x164   :  { %v370_v53 = vmul.f32 %v366_v55, %v1529_v29  ;;  %v418_v31 = vpop.permute.xlu0 %417 }
 0x165   :  { %v425_v57 = vrot.slane %v418_v31, 4 }
 0x166   :  { %v904_v26 = vrot.slane %v370_v53, 9 }
 0x167   :  { %v429_v62 = vsel %vm77_vm0, %v425_v57, %v426_v8  ;;  %v544_v2 = vpop.permute.xlu1 %543  ;;  %v688_v8 = vmul.f32 %v683_v52, %v1529_v29 }
 0x168   :  { %v380_v39 = vadd.f32 %v904_v26, %v313_v3  ;;  %v431_v0 = vsel %vm430_vm5, %v418_v31, %v429_v62  ;;  %v549_v1 = vrot.slane %v544_v2, 4  ;;  %v736_v3 = vrot.slane %v729_v48, 4 }
 0x169   :  { %v436_v59 = vmul.f32 %v431_v0, %v1529_v29 }
 0x16a   :  { %v447_v50 = vadd.f32 %v908_v54, %v380_v39  ;;  %v554_v19 = vsel %vm77_vm0, %v549_v1, %v550_v23  ;;  %v740_v15 = vsel %vm77_vm0, %v736_v3, %v737_v21 }
 0x16b   :  { %v907_v11 = vrot.slane %v436_v59, 10  ;;  %v555_v7 = vsel %vm552_vm6, %v544_v2, %v554_v19  ;;  %v742_v57 = vsel %vm741_vm10, %v729_v48, %v740_v15 }
 0x16c   :  { %v502_v35 = vadd.f32 %v500_v16, %v447_v50  ;;  %v559_v13 = vmul.f32 %v555_v7, %v1529_v29  ;;  %v607_v42 = vpop.permute.xlu0 %606  ;;  %v747_v26 = vmul.f32 %v742_v57, %v1529_v29 }
 0x16d   :  { %v446_v40 = vadd.f32 %v907_v11, %v379_v4  ;;  %v614_v61 = vrot.slane %v607_v42, 4  ;;  %v805_v4 = vrot.slane %v800_v44, 4 }
 0x16e   :  { %v914_v43 = vrot.slane %v559_v13, 9  ;;  %v923_v39 = vrot.slane %v747_v26, 9 }
 0x16f   :  { %v501_v25 = vadd.f32 %v499_v36, %v446_v40  ;;  %v618_v23 = vsel %vm77_vm0, %v614_v61, %v615_v33  ;;  %v733_v18 = vpop.permute.xlu1 %732 }
 0x170   :  { %v569_v22 = vadd.f32 %v914_v43, %v502_v35  ;;  %v620_v51 = vsel %vm619_vm8, %v607_v42, %v618_v23  ;;  %v738_v55 = vrot.slane %v733_v18, 4 }
 0x171   :  { %v625_v38 = vmul.f32 %v620_v51, %v1529_v29  ;;  %v568_v10 = vadd.f32 %v913_v34, %v501_v25 }
 0x172   :  { %v636_v9 = vadd.f32 %v918_v24, %v569_v22  ;;  %v743_v60 = vsel %vm77_vm0, %v738_v55, %v739_v28 }
 0x173   :  { %v917_v53 = vrot.slane %v625_v38, 10  ;;  %v744_v54 = vsel %vm741_vm10, %v733_v18, %v743_v60 }
 0x174   :  { %v691_v31 = vadd.f32 %v689_v12, %v636_v9  ;;  %v796_v56 = vpop.permute.xlu0 %795  ;;  %v748_v2 = vmul.f32 %v744_v54, %v1529_v29 }
 0x175   :  { %v635_v58 = vadd.f32 %v917_v53, %v568_v10  ;;  %v803_v41 = vrot.slane %v796_v56, 4 }
 0x176   :  { %v924_v32 = vrot.slane %v748_v2, 9 }
 0x177   :  { %v690_v37 = vadd.f32 %v688_v8, %v635_v58  ;;  %v798_v49 = vpop.permute.xlu1 %797 }
 0x178   :  { %v804_v30 = vrot.slane %v798_v49, 4  ;;  %v758_v48 = vadd.f32 %v924_v32, %v691_v31 }
 0x179   :  { %v757_v6 = vadd.f32 %v923_v39, %v690_v37 }
 0x17a   :  { %v807_v62 = vsel %vm77_vm0, %v803_v41, %v804_v30 }
 0x17b   :  { %v809_v63 = vsel %vm808_vm11, %v796_v56, %v807_v62 }
 0x17c   :  { %v814_v0 = vmul.f32 %v809_v63, %v1529_v29  ;;  %v802_v1 = vpop.permute.xlu0 %801 }
 0x17d   :  { %v806_v5 = vrot.slane %v802_v1, 4 }
 0x17e   :  { %v927_v59 = vrot.slane %v814_v0, 10 }
 0x17f   :  { %v810_v16 = vsel %vm77_vm0, %v805_v4, %v806_v5 }
 0x180   :  { %v824_v50 = vadd.f32 %v927_v59, %v757_v6  ;;  %v811_v19 = vsel %vm808_vm11, %v800_v44, %v810_v16 }
 0x181   :  { %v815_v33 = vmul.f32 %v811_v19, %v1529_v29 }
 0x182   :  { %v929_v14 = vmul.f32 -1.442695, %v824_v50 }
 0x183   :  { %v928_v11 = vrot.slane %v815_v33, 10 }
 0x184   :  { %948 = vpow2.f32 %v929_v14 }
 0x185   :  { %v825_v7 = vadd.f32 %v928_v11, %v758_v48 }
 0x187   :  { %v930_v46 = vmul.f32 -1.442695, %v825_v7 }
 0x189   :  { %950 = vpow2.f32 %v930_v46 }
 0x18a   :  { %v949_v17 = vpop.eup %948 }
 0x18b   :  { %v832_v35 = vadd.f32 1.0, %v949_v17 }
 0x18d   :  { %952 = vrcp.f32 %v832_v35  ;;  %v845_v61 = vand.u32 2147483648, %v832_v35  ;;  %v843_v29 = vand.u32 2147483647, %v832_v35  ;;  %vm839_vm13 = vweird.f32 %v832_v35 }
 0x18f   :  { %v951_v13 = vpop.eup %950  ;;  %v846_v25 = vor.u32 1.1754944e-38, %v845_v61  ;;  %vm844_vm15 = vcmp.eq.f32.partialorder %v843_v29, 8.507059e+37 }
 0x190   :  { %v833_v42 = vadd.f32 1.0, %v951_v13 }
 0x192   :  { %954 = vrcp.f32 %v833_v42  ;;  %v860_v21 = vand.u32 2147483648, %v833_v42  ;;  %v858_v51 = vand.u32 2147483647, %v833_v42  ;;  %vm854_vm3 = vweird.f32 %v833_v42 }
 0x193   :  { %v953_v20 = vpop.eup %952 }
 0x194   :  { %v835_v36 = vmul.f32 %v953_v20, %v832_v35  ;;  %vm840_vm12 = vweird.f32 %v953_v20  ;;  %v861_v55 = vor.u32 1.1754944e-38, %v860_v21  ;;  %vm859_vm5 = vcmp.eq.f32.partialorder %v858_v51, 8.507059e+37 }
 0x195   :  { %vm841_vm14 = vmor %vm839_vm13, %vm840_vm12 }
 0x196   :  { %v836_v40 = vsub.f32 1.0, %v835_v36 }
 0x198   :  { %v955_v3 = vpop.eup %954  ;;  %v837_v43 = vmul.f32 %v953_v20, %v836_v40 }
 0x199   :  { %v850_v27 = vmul.f32 %v955_v3, %v833_v42  ;;  %vm855_vm0 = vweird.f32 %v955_v3 }
 0x19a   :  { %v838_v47 = vadd.f32 %v953_v20, %v837_v43  ;;  %vm856_vm4 = vmor %vm854_vm3, %vm855_vm0 }
 0x19b   :  { %v851_v23 = vsub.f32 1.0, %v850_v27 }
 0x19c   :  { %v842_v18 = vsel %vm841_vm14, %v953_v20, %v838_v47 }
 0x19d   :  { %v847_v24 = vsel %vm844_vm15, %v846_v25, %v842_v18  ;;  %v852_v22 = vmul.f32 %v955_v3, %v851_v23 }
 0x19e   :  { %v866_v34 = vrot.slane %v847_v24, 3 }
 0x19f   :  { %v853_v38 = vadd.f32 %v955_v3, %v852_v22 }
 0x1a0   :  { %v869_v52 = vsel %vm155_vm1, %v847_v24, %v866_v34 }
 0x1a1   :  { %v857_v15 = vsel %vm856_vm4, %v955_v3, %v853_v38  ;;  %877 = vst.msk [vmem:[#allocation12] sm:$0x3] %vm1107_vm2, %v869_v52 }
 0x1a2   :  { %v862_v12 = vsel %vm859_vm5, %v861_v55, %v857_v15 }
 0x1a3   :  { %v867_v9 = vrot.slane %v862_v12, 3 }
 0x1a5   :  { %v870_v28 = vsel %vm155_vm1, %v862_v12, %v867_v9 }
 0x1a6   :  { %878 = vst.msk [vmem:[#allocation12 + $0x2] sm:$0x3] %vm1107_vm2, %v870_v28 }
 0x1a7   :  { %891 = dma.vmem_to_hbm [thread:$0]  %s884_s1, 64, %s886_s5, [#allocation7], %s1063_s6, %s1063_s6, %s1064_s7  }
 0x1a8   :  { %1046 = dma.done.wait [#allocation7], 64  }
 0x1a9   :  { %1047 = vsyncadd [#allocation7], 4294967232 }
 0x1aa   :  { %896 = vsyncpa [#allocation6], 1 }
 0x1ab   :  { %897 = vsyncpa [#allocation10], 1 }
 0x1ac   :  { %898 = vsyncpa [#allocation7], 1 }
 0x1ad   :  { %899 = vsyncpa [#allocation8], 1 }

</bundles_post_ra>
